<compile_context>
chip_gen: v7x
topology: tpu7x:2x2x1
jax: 0.10.0
libtpu: 0.0.40
codegen_flags: <defaults>
</compile_context>

<pallas_src>
import functools

import jax
import jax.numpy as jnp
from jax.experimental import pallas as pl
from jax.experimental.pallas import tpu as pltpu

HIDDEN = 128
SUBLANE = 8


def _round_up(x, m):
    return ((x + m - 1) // m) * m


def _dqn_kernel(x_ref,
                w1_ref, b1_ref,
                w2_ref, b2_ref,
                w3_ref, b3_ref,
                wo_ref, bo_ref,
                out_ref):
    x = x_ref[...]

    h = jnp.dot(x, w1_ref[...], preferred_element_type=jnp.float32) + b1_ref[...]
    h = jnp.maximum(h, 0.0)

    h = jnp.dot(h, w2_ref[...], preferred_element_type=jnp.float32) + b2_ref[...]
    h = jnp.maximum(h, 0.0)

    h = jnp.dot(h, w3_ref[...], preferred_element_type=jnp.float32) + b3_ref[...]
    h = jnp.maximum(h, 0.0)

    out = jnp.dot(h, wo_ref[...], preferred_element_type=jnp.float32) + bo_ref[...]
    out_ref[...] = out.astype(out_ref.dtype)


@functools.partial(jax.jit, static_argnames=("tb",))
def dqn_forward(x, params, *, tb=1024):
    """x: (B, size_s) f32.  params: (in,out) weights, (1,out) biases.

    Returns (B, size_a) f32, identical semantics to the PyTorch DQN.forward.
    """
    B, size_s = x.shape
    size_a = params["wo"].shape[1]

    # Batch tile: multiple of 8 (sublane), capped so that large batches give
    # at least 2 grid steps (keeps both v7x TensorCores busy).  Ragged last
    # tile is handled by Pallas (masked writes), so no batch padding.
    TB = max(SUBLANE, min(tb, _round_up(pl.cdiv(B, 2), SUBLANE)))
    grid = (pl.cdiv(B, TB),)

    operands = (
        x,
        params["w1"], params["b1"],
        params["w2"], params["b2"],
        params["w3"], params["b3"],
        params["wo"], params["bo"],
    )

    # Weights/biases: constant index_map -> DMA'd once, VMEM-resident across
    # all batch tiles.  Activations/output: streamed per grid step.
    const = lambda i: (0, 0)
    in_specs = [
        pl.BlockSpec((TB, size_s), lambda i: (i, 0)),      # x tile (unpadded K)
        pl.BlockSpec((size_s, HIDDEN), const),             # w1
        pl.BlockSpec((1, HIDDEN), const),                  # b1
        pl.BlockSpec((HIDDEN, HIDDEN), const),             # w2
        pl.BlockSpec((1, HIDDEN), const),                  # b2
        pl.BlockSpec((HIDDEN, HIDDEN), const),             # w3
        pl.BlockSpec((1, HIDDEN), const),                  # b3
        pl.BlockSpec((HIDDEN, size_a), const),             # wo (unpadded N)
        pl.BlockSpec((1, size_a), const),                  # bo
    ]

    return pl.pallas_call(
        _dqn_kernel,
        out_shape=jax.ShapeDtypeStruct((B, size_a), jnp.float32),
        grid=grid,
        in_specs=in_specs,
        out_specs=pl.BlockSpec((TB, size_a), lambda i: (i, 0)),
        compiler_params=pltpu.CompilerParams(
            dimension_semantics=("parallel",)),
    )(*operands)


def init_dqn_params(key, size_s, size_a):
    """PyTorch nn.Linear default init: U[-1/sqrt(fan_in), 1/sqrt(fan_in)]."""
    dims = [(size_s, HIDDEN), (HIDDEN, HIDDEN), (HIDDEN, HIDDEN), (HIDDEN, size_a)]
    names = ["1", "2", "3", "o"]
    params = {}
    for (fan_in, fan_out), name in zip(dims, names):
        key, kw, kb = jax.random.split(key, 3)
        bound = 1.0 / jnp.sqrt(jnp.float32(fan_in))
        params[f"w{name}"] = jax.random.uniform(
            kw, (fan_in, fan_out), jnp.float32, minval=-bound, maxval=bound)
        params[f"b{name}"] = jax.random.uniform(
            kb, (1, fan_out), jnp.float32, minval=-bound, maxval=bound)
    return params


def _reference_forward(x, params):
    h = jnp.maximum(x @ params["w1"] + params["b1"], 0.0)
    h = jnp.maximum(h @ params["w2"] + params["b2"], 0.0)
    h = jnp.maximum(h @ params["w3"] + params["b3"], 0.0)
    return h @ params["wo"] + params["bo"]


if __name__ == "__main__":
    key = jax.random.PRNGKey(0)
    size_s, size_a = 16, 4

    kx, kx2, kp = jax.random.split(key, 3)
    params = init_dqn_params(kp, size_s, size_a)

    # Small batch (single grid step, exact tile).
    x_small = jax.random.normal(kx, (8, size_s), jnp.float32)
    out_small = jax.block_until_ready(dqn_forward(x_small, params))
    ref_small = _reference_forward(x_small, params)
    assert out_small.shape == (8, size_a)
    assert jnp.allclose(out_small, ref_small, atol=1e-5, rtol=1e-5)

    # Larger batch exercising 2 grid steps with a ragged last tile
    # (TB=152 -> blocks of 152 and 148 rows), parallel batch axis.
    x_big = jax.random.normal(kx2, (300, size_s), jnp.float32)
    out_big = jax.block_until_ready(dqn_forward(x_big, params))
    ref_big = _reference_forward(x_big, params)
    assert out_big.shape == (300, size_a)
    assert jnp.allclose(out_big, ref_big, atol=1e-5, rtol=1e-5)

    print("KERNEL_OK")
</pallas_src>

<mosaic_0001>
module attributes {stable_mosaic.version = 11 : i64} {
  func.func @_dqn_kernel(%arg0: i32, %arg1: memref<8x16xf32, #tpu.memory_space<vmem>>, %arg2: memref<16x128xf32, #tpu.memory_space<vmem>>, %arg3: memref<1x128xf32, #tpu.memory_space<vmem>>, %arg4: memref<128x128xf32, #tpu.memory_space<vmem>>, %arg5: memref<1x128xf32, #tpu.memory_space<vmem>>, %arg6: memref<128x128xf32, #tpu.memory_space<vmem>>, %arg7: memref<1x128xf32, #tpu.memory_space<vmem>>, %arg8: memref<128x4xf32, #tpu.memory_space<vmem>>, %arg9: memref<1x4xf32, #tpu.memory_space<vmem>>, %arg10: memref<8x4xf32, #tpu.memory_space<vmem>>) attributes {dimension_semantics = [#tpu.dimension_semantics<parallel>], iteration_bounds = array<i64: 1>, scalar_prefetch = 0 : i64, scratch_operands = 0 : i64, tpu.core_type = #tpu.core_type<tc>, window_params = [{transform_indices = @transform_0, window_bounds = array<i64: 8, 16>}, {pipeline_mode = #tpu.pipeline_mode<synchronous>, transform_indices = @transform_1, window_bounds = array<i64: 16, 128>}, {pipeline_mode = #tpu.pipeline_mode<synchronous>, transform_indices = @transform_2, window_bounds = array<i64: 1, 128>}, {pipeline_mode = #tpu.pipeline_mode<synchronous>, transform_indices = @transform_3, window_bounds = array<i64: 128, 128>}, {pipeline_mode = #tpu.pipeline_mode<synchronous>, transform_indices = @transform_4, window_bounds = array<i64: 1, 128>}, {pipeline_mode = #tpu.pipeline_mode<synchronous>, transform_indices = @transform_5, window_bounds = array<i64: 128, 128>}, {pipeline_mode = #tpu.pipeline_mode<synchronous>, transform_indices = @transform_6, window_bounds = array<i64: 1, 128>}, {pipeline_mode = #tpu.pipeline_mode<synchronous>, transform_indices = @transform_7, window_bounds = array<i64: 128, 4>}, {pipeline_mode = #tpu.pipeline_mode<synchronous>, transform_indices = @transform_8, window_bounds = array<i64: 1, 4>}, {transform_indices = @transform_9, window_bounds = array<i64: 8, 4>}]} {
    %c0 = arith.constant 0 : index
    %c0_0 = arith.constant 0 : index
    %0 = vector.load %arg1[%c0, %c0_0] : memref<8x16xf32, #tpu.memory_space<vmem>>, vector<8x16xf32>
    %c0_1 = arith.constant 0 : index
    %c0_2 = arith.constant 0 : index
    %1 = vector.load %arg2[%c0_1, %c0_2] : memref<16x128xf32, #tpu.memory_space<vmem>>, vector<16x128xf32>
    %cst = arith.constant dense<0.000000e+00> : vector<8x128xf32>
    %2 = tpu.matmul %0, %1, %cst {dimension_numbers = #tpu.dot_dimension_numbers<[1], [0], [0], [1], [0, 0, 1, 1], [], []>} : vector<8x16xf32>, vector<16x128xf32>, vector<8x128xf32> -> vector<8x128xf32>
    %c0_3 = arith.constant 0 : index
    %c0_4 = arith.constant 0 : index
    %3 = vector.load %arg3[%c0_3, %c0_4] : memref<1x128xf32, #tpu.memory_space<vmem>>, vector<1x128xf32>
    %4 = vector.broadcast %3 : vector<1x128xf32> to vector<8x128xf32>
    %5 = arith.addf %2, %4 : vector<8x128xf32>
    %cst_5 = arith.constant 0.000000e+00 : f32
    %6 = vector.broadcast %cst_5 : f32 to vector<8x128xf32>
    %7 = arith.maximumf %5, %6 : vector<8x128xf32>
    %c0_6 = arith.constant 0 : index
    %c0_7 = arith.constant 0 : index
    %8 = vector.load %arg4[%c0_6, %c0_7] : memref<128x128xf32, #tpu.memory_space<vmem>>, vector<128x128xf32>
    %cst_8 = arith.constant dense<0.000000e+00> : vector<8x128xf32>
    %9 = tpu.matmul %7, %8, %cst_8 {dimension_numbers = #tpu.dot_dimension_numbers<[1], [0], [0], [1], [0, 0, 1, 1], [], []>} : vector<8x128xf32>, vector<128x128xf32>, vector<8x128xf32> -> vector<8x128xf32>
    %c0_9 = arith.constant 0 : index
    %c0_10 = arith.constant 0 : index
    %10 = vector.load %arg5[%c0_9, %c0_10] : memref<1x128xf32, #tpu.memory_space<vmem>>, vector<1x128xf32>
    %11 = vector.broadcast %10 : vector<1x128xf32> to vector<8x128xf32>
    %12 = arith.addf %9, %11 : vector<8x128xf32>
    %cst_11 = arith.constant 0.000000e+00 : f32
    %13 = vector.broadcast %cst_11 : f32 to vector<8x128xf32>
    %14 = arith.maximumf %12, %13 : vector<8x128xf32>
    %c0_12 = arith.constant 0 : index
    %c0_13 = arith.constant 0 : index
    %15 = vector.load %arg6[%c0_12, %c0_13] : memref<128x128xf32, #tpu.memory_space<vmem>>, vector<128x128xf32>
    %cst_14 = arith.constant dense<0.000000e+00> : vector<8x128xf32>
    %16 = tpu.matmul %14, %15, %cst_14 {dimension_numbers = #tpu.dot_dimension_numbers<[1], [0], [0], [1], [0, 0, 1, 1], [], []>} : vector<8x128xf32>, vector<128x128xf32>, vector<8x128xf32> -> vector<8x128xf32>
    %c0_15 = arith.constant 0 : index
    %c0_16 = arith.constant 0 : index
    %17 = vector.load %arg7[%c0_15, %c0_16] : memref<1x128xf32, #tpu.memory_space<vmem>>, vector<1x128xf32>
    %18 = vector.broadcast %17 : vector<1x128xf32> to vector<8x128xf32>
    %19 = arith.addf %16, %18 : vector<8x128xf32>
    %cst_17 = arith.constant 0.000000e+00 : f32
    %20 = vector.broadcast %cst_17 : f32 to vector<8x128xf32>
    %21 = arith.maximumf %19, %20 : vector<8x128xf32>
    %c0_18 = arith.constant 0 : index
    %c0_19 = arith.constant 0 : index
    %22 = vector.load %arg8[%c0_18, %c0_19] : memref<128x4xf32, #tpu.memory_space<vmem>>, vector<128x4xf32>
    %cst_20 = arith.constant dense<0.000000e+00> : vector<8x4xf32>
    %23 = tpu.matmul %21, %22, %cst_20 {dimension_numbers = #tpu.dot_dimension_numbers<[1], [0], [0], [1], [0, 0, 1, 1], [], []>} : vector<8x128xf32>, vector<128x4xf32>, vector<8x4xf32> -> vector<8x4xf32>
    %c0_21 = arith.constant 0 : index
    %c0_22 = arith.constant 0 : index
    %24 = vector.load %arg9[%c0_21, %c0_22] : memref<1x4xf32, #tpu.memory_space<vmem>>, vector<1x4xf32>
    %25 = vector.broadcast %24 : vector<1x4xf32> to vector<8x4xf32>
    %26 = arith.addf %23, %25 : vector<8x4xf32>
    %c0_23 = arith.constant 0 : index
    %c0_24 = arith.constant 0 : index
    %27 = vector.load %arg10[%c0_23, %c0_24] : memref<8x4xf32, #tpu.memory_space<vmem>>, vector<8x4xf32>
    tpu.vector_store %arg10[%c0_23, %c0_24], %26 {strides = array<i32>} : memref<8x4xf32, #tpu.memory_space<vmem>>, vector<8x4xf32>,
    return
  }
  func.func @transform_0(%arg0: i32) -> (i32, i32) {
    %c0_i32 = arith.constant 0 : i32
    %c0_i32_0 = arith.constant 0 : i32
    return %arg0, %c0_i32 : i32, i32
  }
  func.func @transform_1(%arg0: i32) -> (i32, i32) {
    %c0_i32 = arith.constant 0 : i32
    %c0_i32_0 = arith.constant 0 : i32
    %c0_i32_1 = arith.constant 0 : i32
    return %c0_i32, %c0_i32_0 : i32, i32
  }
  func.func @transform_2(%arg0: i32) -> (i32, i32) {
    %c0_i32 = arith.constant 0 : i32
    %c0_i32_0 = arith.constant 0 : i32
    %c0_i32_1 = arith.constant 0 : i32
    return %c0_i32, %c0_i32_0 : i32, i32
  }
  func.func @transform_3(%arg0: i32) -> (i32, i32) {
    %c0_i32 = arith.constant 0 : i32
    %c0_i32_0 = arith.constant 0 : i32
    %c0_i32_1 = arith.constant 0 : i32
    return %c0_i32, %c0_i32_0 : i32, i32
  }
  func.func @transform_4(%arg0: i32) -> (i32, i32) {
    %c0_i32 = arith.constant 0 : i32
    %c0_i32_0 = arith.constant 0 : i32
    %c0_i32_1 = arith.constant 0 : i32
    return %c0_i32, %c0_i32_0 : i32, i32
  }
  func.func @transform_5(%arg0: i32) -> (i32, i32) {
    %c0_i32 = arith.constant 0 : i32
    %c0_i32_0 = arith.constant 0 : i32
    %c0_i32_1 = arith.constant 0 : i32
    return %c0_i32, %c0_i32_0 : i32, i32
  }
  func.func @transform_6(%arg0: i32) -> (i32, i32) {
    %c0_i32 = arith.constant 0 : i32
    %c0_i32_0 = arith.constant 0 : i32
    %c0_i32_1 = arith.constant 0 : i32
    return %c0_i32, %c0_i32_0 : i32, i32
  }
  func.func @transform_7(%arg0: i32) -> (i32, i32) {
    %c0_i32 = arith.constant 0 : i32
    %c0_i32_0 = arith.constant 0 : i32
    %c0_i32_1 = arith.constant 0 : i32
    return %c0_i32, %c0_i32_0 : i32, i32
  }
  func.func @transform_8(%arg0: i32) -> (i32, i32) {
    %c0_i32 = arith.constant 0 : i32
    %c0_i32_0 = arith.constant 0 : i32
    %c0_i32_1 = arith.constant 0 : i32
    return %c0_i32, %c0_i32_0 : i32, i32
  }
  func.func @transform_9(%arg0: i32) -> (i32, i32) {
    %c0_i32 = arith.constant 0 : i32
    %c0_i32_0 = arith.constant 0 : i32
    return %arg0, %c0_i32 : i32, i32
  }
}

</mosaic_0001>

<bundles_post_ra>
// kernel: dqn_forward.1
= control target key start
LH: loop header
LB: loop body
LE: loop exit
PB: predicated region body
PF: predicated region fallthrough
CT: control target
= control target key end

     0   :  { %14 = vsyncpa [#allocation3], 0  ;;  %s1015_s0 = inlined_call_operand.vmem [shape: f32[8,16], index: 0, kind: input, shape index: {}]   ;;  %s1016_s1 = inlined_call_operand.vmem [shape: f32[16,128], index: 1, kind: input, shape index: {}]   ;;  %s1017_s2 = inlined_call_operand.vmem [shape: f32[1,128], index: 2, kind: input, shape index: {}]   ;;  %s1018_s3 = inlined_call_operand.vmem [shape: f32[128,128], index: 3, kind: input, shape index: {}]   ;;  %s1019_s4 = inlined_call_operand.vmem [shape: f32[1,128], index: 4, kind: input, shape index: {}]   ;;  %s1020_s5 = inlined_call_operand.hbm [shape: f32[128,128], index: 5, kind: input, shape index: {}]   ;;  %s1021_s6 = inlined_call_operand.hbm [shape: f32[1,128], index: 6, kind: input, shape index: {}]   ;;  %s1022_s7 = inlined_call_operand.vmem [shape: f32[128,4], index: 7, kind: input, shape index: {}]   ;;  %s1023_s8 = inlined_call_operand.hbm [shape: f32[1,4], index: 8, kind: input, shape index: {}]   ;;  %s1024_s9 = inlined_call_operand.vmem [shape: f32[8,4], index: 9, kind: output, shape index: {}]  }
   0x1   :  { %15 = vsyncpa [#allocation5], 0  ;;  %s767_s30 = smov [#allocation4]   ;;  %s768_s11 = smov [#allocation2]  }
   0x2   :  { %s44_s10 = sshll.u32 %s767_s30, 4  ;;  %s31_s12 = sshll.u32 %s768_s11, 4  ;;  %s45_s10 = int_to_ptr.vmem [resolvable:$true] %s44_s10  ;;  %s825_s12 = int_to_ptr.vmem [resolvable:$true] %s31_s12 }
   0x3   :  { %s697_s15 = scalar_lea.hbm %s1021_s6, 16 }
   0x4   :  { %p698_p0 = scmp.ne.s32.totalorder %s1021_s6, %s697_s15  ;;  %p701_p1 = scmp.lt.u32.totalorder %s697_s15, %s1021_s6 }
   0x6   :  { %p703_p2 = pnand %p701_p1, %p698_p0 }
   0x8   :  { %706 = shalt.err (!%p703_p2)
}
   0x9   :  { %s707_s20 = scalar_lea.vmem %s45_s10, 16  ;;  %s711_s21 = scalar_lea.vmem %s45_s10, 32 }
   0xa   :  { %p708_p3 = scmp.ne.s32.totalorder %s45_s10, %s707_s20  ;;  %p712_p4 = scmp.lt.s32.totalorder %s45_s10, %s45_s10 }
   0xb   :  { %p713_p5 = scmp.lt.s32.totalorder %s711_s21, %s707_s20 }
   0xd   :  { %p714_p6 = por %p713_p5, %p712_p4 }
   0xf   :  { %p715_p7 = pnand %p714_p6, %p708_p3 }
  0x11   :  { %718 = shalt.err (!%p715_p7)
}
  0x12   :  { %47 = dma.hbm_to_vmem [thread:$0]  %s1021_s6, 16, %s45_s10, [#allocation5]  }
  0x13   :  { %s719_s26 = scalar_lea.hbm %s1020_s5, 2048 }
  0x14   :  { %p720_p8 = scmp.ne.s32.totalorder %s1020_s5, %s719_s26  ;;  %p723_p9 = scmp.lt.u32.totalorder %s719_s26, %s1020_s5 }
  0x16   :  { %p725_p10 = pnand %p723_p9, %p720_p8 }
  0x18   :  { %728 = shalt.err (!%p725_p10)
}
  0x19   :  { %s729_s11 = scalar_lea.vmem %s825_s12, 2048  ;;  %p734_p12 = scmp.lt.s32.totalorder %s825_s12, %s825_s12 }
  0x1a   :  { %p730_p11 = scmp.ne.s32.totalorder %s825_s12, %s729_s11  ;;  %p735_p13 = scmp.lt.s32.totalorder %s729_s11, %s729_s11 }
  0x1c   :  { %p736_p0 = por %p735_p13, %p734_p12 }
  0x1e   :  { %p737_p1 = pnand %p736_p0, %p730_p11 }
  0x20   :  { %740 = shalt.err (!%p737_p1)
}
  0x21   :  { %s769_s6 = smov 128   ;;  %s770_s10 = smov 8  }
  0x22   :  { %37 = dma.hbm_to_vmem [thread:$0]  %s1020_s5, 2048, %s825_s12, [#allocation3], %s769_s6, %s769_s6, %s770_s10  }
  0x23   :  { %s771_s15 = smov [#allocation6]   ;;  %s741_s19 = scalar_lea.hbm %s1023_s8, 16 }
  0x24   :  { %s56_s16 = sshll.u32 %s771_s15, 4  ;;  %p742_p2 = scmp.ne.s32.totalorder %s1023_s8, %s741_s19  ;;  %s57_s16 = int_to_ptr.vmem [resolvable:$true] %s56_s16 }
  0x25   :  { %p745_p3 = scmp.lt.u32.totalorder %s741_s19, %s1023_s8 }
  0x27   :  { %p747_p4 = pnand %p745_p3, %p742_p2 }
  0x29   :  { %750 = shalt.err (!%p747_p4)
}
  0x2a   :  { %s751_s24 = scalar_lea.vmem %s57_s16, 16  ;;  %s755_s5 = scalar_lea.vmem %s57_s16, 32 }
  0x2b   :  { %p752_p5 = scmp.ne.s32.totalorder %s57_s16, %s751_s24  ;;  %p756_p6 = scmp.lt.s32.totalorder %s57_s16, %s57_s16 }
  0x2c   :  { %p757_p7 = scmp.lt.s32.totalorder %s755_s5, %s751_s24 }
  0x2e   :  { %p758_p8 = por %p757_p7, %p756_p6 }
  0x30   :  { %p759_p9 = pnand %p758_p8, %p752_p5 }
  0x32   :  { %762 = shalt.err (!%p759_p9)
}
  0x33   :  { %59 = dma.hbm_to_vmem [thread:$0]  %s1023_s8, 16, %s57_s16, [#allocation5]  }
  0x34   :  { %763 = dma.done.wait [#allocation3], 2048  }
  0x35   :  { %764 = vsyncadd [#allocation3], 4294965248 }
  0x36   :  { %765 = dma.done.wait [#allocation5], 32  }
  0x37   :  { %766 = vsyncadd [#allocation5], 4294967264  ;;  %v772_v0 = vmov 0.0|0.0   ;;  %vm773_vm0 = vmmov 0   ;;  %v774_v1 = vmov 0.0   ;;  %v70_v2 = vld [vmem:[%s1016_s1] sm:$0xff] }
  0x38   :  { %614 = vmatprep.subr.bf16.mxu0 %v772_v0  ;;  %506 = vmatprep.mubr.msk.f32.mxu0 %vm773_vm0, %v774_v1  ;;  %v71_v3 = vld [vmem:[%s1016_s1 + $0x8] sm:$0xff]  ;;  %v154_v5 = vld [vmem:[%s1018_s3] sm:$0xff]  ;;  %v156_v7 = vld [vmem:[%s1018_s3 + $0x10] sm:$0xff]  ;;  %vm79_vm1 = vcmask 130048   ;;  %vm435_vm2 = vcmask 31744  }
  0x39   :  { %617 = vmatprep.subr.bf16.mxu1 %v772_v0  ;;  %541 = vmatprep.mubr.msk.f32.mxu1 %vm773_vm0, %v774_v1  ;;  %v615_v4 = vpack.c.bf16 %v71_v3, %v70_v2  ;;  %v155_v6 = vld [vmem:[%s1018_s3 + $0x8] sm:$0xff]  ;;  %v157_v9 = vld [vmem:[%s1018_s3 + $0x18] sm:$0xff]  ;;  %v69_v10 = vld [vmem:[%s1015_s0] sm:$0xff] }
  0x3a   :  { %v618_v8 = vpack.c.bf16 %v155_v6, %v154_v5  ;;  %v621_v11 = vpack.c.bf16 %v157_v9, %v156_v7  ;;  %v158_v12 = vld [vmem:[%s1018_s3 + $0x20] sm:$0xff]  ;;  %v159_v13 = vld [vmem:[%s1018_s3 + $0x28] sm:$0xff]  ;;  %v160_v15 = vld [vmem:[%s1018_s3 + $0x30] sm:$0xff] }
  0x3b   :  { %616 = vmatpush3.bf16.msra.mxu0 %v615_v4  ;;  %v624_v14 = vpack.c.bf16 %v159_v13, %v158_v12  ;;  %v161_v16 = vld [vmem:[%s1018_s3 + $0x38] sm:$0xff]  ;;  %v162_v18 = vld [vmem:[%s1018_s3 + $0x40] sm:$0xff]  ;;  %v163_v19 = vld [vmem:[%s1018_s3 + $0x48] sm:$0xff] }
  0x3c   :  { %619 = vmatpush3.bf16.msra.mxu1 %v618_v8  ;;  %641 = vmatprep.subr.bf16.mxu0 %v772_v0  ;;  %v627_v17 = vpack.c.bf16 %v161_v16, %v160_v15  ;;  %v630_v20 = vpack.c.bf16 %v163_v19, %v162_v18  ;;  %v164_v21 = vld [vmem:[%s1018_s3 + $0x50] sm:$0xff]  ;;  %v165_v22 = vld [vmem:[%s1018_s3 + $0x58] sm:$0xff]  ;;  %v166_v24 = vld [vmem:[%s1018_s3 + $0x60] sm:$0xff] }
  0x3d   :  { %620 = vmatprep.subr.bf16.mxu1 %v772_v0  ;;  %v633_v23 = vpack.c.bf16 %v165_v22, %v164_v21  ;;  %v167_v25 = vld [vmem:[%s1018_s3 + $0x68] sm:$0xff]  ;;  %v168_v27 = vld [vmem:[%s1018_s3 + $0x70] sm:$0xff]  ;;  %v169_v28 = vld [vmem:[%s1018_s3 + $0x78] sm:$0xff] }
  0x3e   :  { %507 = vmatmul.mubr.msk.f32.vlgmr.msra.gmra.mrb[0].mxu0 %vm79_vm1, %v69_v10  ;;  %v636_v26 = vpack.c.bf16 %v167_v25, %v166_v24  ;;  %v639_v29 = vpack.c.bf16 %v169_v28, %v168_v27  ;;  %v248_v30 = vld [vmem:[#allocation2] sm:$0xff]  ;;  %v249_v31 = vld [vmem:[#allocation2 + $0x8] sm:$0xff]  ;;  %v250_v32 = vld [vmem:[#allocation2 + $0x10] sm:$0xff] }
  0x3f   :  { %576 = vmatprep.mubr.msk.f32.mxu0 %vm773_vm0, %v774_v1  ;;  %v642_v33 = vpack.c.bf16 %v249_v31, %v248_v30  ;;  %v251_v34 = vld [vmem:[#allocation2 + $0x18] sm:$0xff]  ;;  %v252_v36 = vld [vmem:[#allocation2 + $0x20] sm:$0xff]  ;;  %v253_v37 = vld [vmem:[#allocation2 + $0x28] sm:$0xff] }
  0x40   :  { %622 = vmatpush3.bf16.msra.mxu1 %v621_v11  ;;  %v645_v35 = vpack.c.bf16 %v251_v34, %v250_v32  ;;  %v648_v38 = vpack.c.bf16 %v253_v37, %v252_v36  ;;  %v254_v39 = vld [vmem:[#allocation2 + $0x30] sm:$0xff]  ;;  %v255_v40 = vld [vmem:[#allocation2 + $0x38] sm:$0xff]  ;;  %v256_v42 = vld [vmem:[#allocation2 + $0x40] sm:$0xff] }
  0x41   :  { %623 = vmatprep.subr.bf16.mxu1 %v772_v0  ;;  %643 = vmatpush3.bf16.msra.mxu0 %v642_v33  ;;  %v651_v41 = vpack.c.bf16 %v255_v40, %v254_v39  ;;  %v257_v43 = vld [vmem:[#allocation2 + $0x48] sm:$0xff]  ;;  %v258_v45 = vld [vmem:[#allocation2 + $0x50] sm:$0xff]  ;;  %v259_v46 = vld [vmem:[#allocation2 + $0x58] sm:$0xff] }
  0x42   :  { %644 = vmatprep.subr.bf16.mxu0 %v772_v0  ;;  %v654_v44 = vpack.c.bf16 %v257_v43, %v256_v42  ;;  %v657_v47 = vpack.c.bf16 %v259_v46, %v258_v45  ;;  %v260_v48 = vld [vmem:[#allocation2 + $0x60] sm:$0xff]  ;;  %v261_v49 = vld [vmem:[#allocation2 + $0x68] sm:$0xff]  ;;  %v262_v56 = vld [vmem:[#allocation2 + $0x70] sm:$0xff] }
  0x43   :  { %v660_v50 = vpack.c.bf16 %v261_v49, %v260_v48  ;;  %v443_v51 = vld [vmem:[%s1017_s2] ss:$0 sm:$0xff]  ;;  %v263_v57 = vld [vmem:[#allocation2 + $0x78] sm:$0xff]  ;;  %v343_v60 = vld [vmem:[%s1022_s7 + $0x8] sm:$0xff] }
  0x44   :  { %625 = vmatpush3.bf16.msra.mxu1 %v624_v14  ;;  %v663_v58 = vpack.c.bf16 %v263_v57, %v262_v56  ;;  %v342_v59 = vld [vmem:[%s1022_s7] sm:$0xff]  ;;  %v344_v61 = vld [vmem:[%s1022_s7 + $0x10] sm:$0xff]  ;;  %v345_v63 = vld [vmem:[%s1022_s7 + $0x18] sm:$0xff] }
  0x45   :  { %626 = vmatprep.subr.bf16.mxu1 %v772_v0  ;;  %646 = vmatpush3.bf16.msra.mxu0 %v645_v35  ;;  %v666_v62 = vpack.c.bf16 %v343_v60, %v342_v59  ;;  %v346_v2 = vld [vmem:[%s1022_s7 + $0x20] sm:$0xff]  ;;  %v347_v3 = vld [vmem:[%s1022_s7 + $0x28] sm:$0xff]  ;;  %v348_v5 = vld [vmem:[%s1022_s7 + $0x30] sm:$0xff] }
  0x46   :  { %647 = vmatprep.subr.bf16.mxu0 %v772_v0  ;;  %v672_v4 = vpack.c.bf16 %v347_v3, %v346_v2  ;;  %v349_v6 = vld [vmem:[%s1022_s7 + $0x38] sm:$0xff]  ;;  %v350_v8 = vld [vmem:[%s1022_s7 + $0x40] sm:$0xff]  ;;  %v351_v9 = vld [vmem:[%s1022_s7 + $0x48] sm:$0xff] }
  0x47   :  { %v675_v7 = vpack.c.bf16 %v349_v6, %v348_v5  ;;  %v678_v10 = vpack.c.bf16 %v351_v9, %v350_v8  ;;  %v352_v11 = vld [vmem:[%s1022_s7 + $0x50] sm:$0xff]  ;;  %v353_v12 = vld [vmem:[%s1022_s7 + $0x58] sm:$0xff]  ;;  %v354_v14 = vld [vmem:[%s1022_s7 + $0x60] sm:$0xff] }
  0x48   :  { %628 = vmatpush3.bf16.msra.mxu1 %v627_v17  ;;  %v681_v13 = vpack.c.bf16 %v353_v12, %v352_v11  ;;  %v355_v15 = vld [vmem:[%s1022_s7 + $0x68] sm:$0xff]  ;;  %v445_v17 = vld [vmem:[%s1019_s4] ss:$0 sm:$0xff]  ;;  %v356_v22 = vld [vmem:[%s1022_s7 + $0x70] sm:$0xff] }
  0x49   :  { %629 = vmatprep.subr.bf16.mxu1 %v772_v0  ;;  %649 = vmatpush3.bf16.msra.mxu0 %v648_v38  ;;  %v684_v16 = vpack.c.bf16 %v355_v15, %v354_v14 }
  0x4a   :  { %650 = vmatprep.subr.bf16.mxu0 %v772_v0 }
  0x4c   :  { %631 = vmatpush3.bf16.msra.mxu1 %v630_v20 }
  0x4d   :  { %632 = vmatprep.subr.bf16.mxu1 %v772_v0  ;;  %652 = vmatpush3.bf16.msra.mxu0 %v651_v41 }
  0x4e   :  { %653 = vmatprep.subr.bf16.mxu0 %v772_v0 }
  0x50   :  { %634 = vmatpush3.bf16.msra.mxu1 %v633_v23  ;;  %v357_v23 = vld [vmem:[%s1022_s7 + $0x78] sm:$0xff] }
  0x51   :  { %635 = vmatprep.subr.bf16.mxu1 %v772_v0  ;;  %655 = vmatpush3.bf16.msra.mxu0 %v654_v44  ;;  %v687_v24 = vpack.c.bf16 %v357_v23, %v356_v22 }
  0x52   :  { %656 = vmatprep.subr.bf16.mxu0 %v772_v0 }
  0x54   :  { %637 = vmatpush3.bf16.msra.mxu1 %v636_v26 }
  0x55   :  { %638 = vmatprep.subr.bf16.mxu1 %v772_v0  ;;  %658 = vmatpush3.bf16.msra.mxu0 %v657_v47 }
  0x56   :  { %659 = vmatprep.subr.bf16.mxu0 %v772_v0 }
  0x58   :  { %640 = vmatpush3.bf16.msra.mxu1 %v639_v29  ;;  %v447_v29 = vld [vmem:[#allocation6] ss:$0 sm:$0xff] }
  0x59   :  { %665 = vmatprep.subr.bf16.mxu1 %v772_v0  ;;  %661 = vmatpush3.bf16.msra.mxu0 %v660_v50 }
  0x5a   :  { %662 = vmatprep.subr.bf16.mxu0 %v772_v0 }
  0x5d   :  { %664 = vmatpush3.bf16.msra.mxu0 %v663_v58 }
 0x111   :  { %v149_v52 = vpop.f32.mrb[0].mxu0 }
 0x112   :  { %v150_v53 = vadd.f32 %v443_v51, %v149_v52  ;;  %v508_v54 = vpop.f32.mrb[1].mxu0 }
 0x114   :  { %v153_v55 = vmax.f32 %v150_v53, 0.0 }
 0x116   :  { %542 = vmatmul.mubr.f32.vlgmr.msra.gmra.mrb[0].mxu1 %v153_v55 }
 0x117   :  { %611 = vmatprep.mubr.msk.f32.mxu1 %vm773_vm0, %v774_v1  ;;  %667 = vmatpush3.bf16.msra.mxu1 %v666_v62  ;;  %v669_v1 = vpack.c.bf16 %v345_v63, %v344_v61 }
 0x118   :  { %668 = vmatprep.subr.bf16.mxu1 %v772_v0 }
 0x11b   :  { %670 = vmatpush3.bf16.msra.mxu1 %v669_v1 }
 0x11c   :  { %671 = vmatprep.subr.bf16.mxu1 %v772_v0 }
 0x11f   :  { %673 = vmatpush3.bf16.msra.mxu1 %v672_v4 }
 0x120   :  { %674 = vmatprep.subr.bf16.mxu1 %v772_v0 }
 0x123   :  { %676 = vmatpush3.bf16.msra.mxu1 %v675_v7 }
 0x124   :  { %677 = vmatprep.subr.bf16.mxu1 %v772_v0 }
 0x127   :  { %679 = vmatpush3.bf16.msra.mxu1 %v678_v10 }
 0x128   :  { %680 = vmatprep.subr.bf16.mxu1 %v772_v0 }
 0x12b   :  { %682 = vmatpush3.bf16.msra.mxu1 %v681_v13 }
 0x12c   :  { %683 = vmatprep.subr.bf16.mxu1 %v772_v0 }
 0x12f   :  { %685 = vmatpush3.bf16.msra.mxu1 %v684_v16 }
 0x130   :  { %686 = vmatprep.subr.bf16.mxu1 %v772_v0  ;;  %v446_v0 = vld [vmem:[#allocation4] ss:$0 sm:$0xff] }
 0x133   :  { %688 = vmatpush3.bf16.msra.mxu1 %v687_v24 }
 0x1e9   :  { %v243_v18 = vpop.f32.mrb[0].mxu1 }
 0x1ea   :  { %v244_v19 = vadd.f32 %v445_v17, %v243_v18  ;;  %v543_v20 = vpop.f32.mrb[1].mxu1 }
 0x1ec   :  { %v247_v21 = vmax.f32 %v244_v19, 0.0 }
 0x1ee   :  { %577 = vmatmul.mubr.f32.vlgmr.msra.gmra.mrb[2].mxu0 %v247_v21 }
 0x2c1   :  { %v337_v25 = vpop.f32.mrb[2].mxu0 }
 0x2c2   :  { %v338_v26 = vadd.f32 %v446_v0, %v337_v25  ;;  %v578_v27 = vpop.f32.mrb[3].mxu0 }
 0x2c4   :  { %v341_v28 = vmax.f32 %v338_v26, 0.0 }
 0x2c6   :  { %612 = vmatmul.mubr.f32.vlgmr.msra.gmra.mrb[2].mxu1 %v341_v28 }
 0x399   :  { %v431_v30 = vpop.f32.mrb[2].mxu1 }
 0x39a   :  { %v432_v31 = vadd.f32 %v447_v29, %v431_v30  ;;  %v613_v32 = vpop.f32.mrb[3].mxu1 }
 0x39c   :  { %436 = vst.msk [vmem:[%s1024_s9] sm:$0xff] %vm435_vm2, %v432_v31 }
 0x39d   :  { %441 = vsyncpa [#allocation3], 1 }
 0x39e   :  { %442 = vsyncpa [#allocation5], 1 }

</bundles_post_ra>
